<compile_context>
chip_gen: v5e
topology: v5e:2x2
jax: 0.10.0
libtpu: 0.0.40
codegen_flags: <defaults>
</compile_context>

<pallas_src>
import jax
import jax.numpy as jnp
from jax.experimental import pallas as pl
from jax.experimental.pallas import tpu as pltpu


def critic_kernel(state_ref, action_ref, w1_ref, b1_ref, w2_ref, b2_ref,
                  wq_ref, bq_ref, q_ref):
    # The single deliberate cast (mirrors `x = x.float()` in the PyTorch spec).
    s = state_ref[...].astype(jnp.float32)          # (B, S)
    a = action_ref[...].astype(jnp.float32)         # (B, A)
    S = state_ref.shape[1]                          # static

    # fc1: concat-free — split w1 rows with static slices (zero-cost views).
    h1 = (jnp.dot(s, w1_ref[:S, :], preferred_element_type=jnp.float32)
          + jnp.dot(a, w1_ref[S:, :], preferred_element_type=jnp.float32)
          + b1_ref[...])
    h1 = jnp.maximum(h1, 0.0)                       # ReLU

    # fc2
    h2 = jnp.dot(h1, w2_ref[...], preferred_element_type=jnp.float32) + b2_ref[...]
    h2 = jnp.maximum(h2, 0.0)                       # ReLU

    # q head (out_features=1): VPU mul + XLU lane reduce instead of an N=1 MXU
    # matmul; bq is a scalar read from SMEM.
    q = jnp.sum(h2 * wq_ref[...], axis=1, keepdims=True) + bq_ref[0]
    q_ref[...] = q.astype(q_ref.dtype)


def critic_forward(state, action, params, *, batch_block=None):
    """state: (B, state_dim), action: (B, action_dim) -> q: (B, 1).

    batch_block=None  -> single fused invocation, no grid (best for small B).
    batch_block=k     -> grid over batch in blocks of k (marked "parallel" so
                         both TensorCores are used on v7x); weights stay
                         resident in VMEM across grid steps.
    """
    w1, b1, w2, b2, wq, bq = params
    B, S = state.shape
    A = action.shape[1]
    H = w1.shape[1]
    out_shape = jax.ShapeDtypeStruct((B, 1), jnp.float32)

    smem_spec = pl.BlockSpec(memory_space=pltpu.MemorySpace.SMEM)

    if batch_block is None or batch_block >= B:
        # No grid: avoids the ~600-cycle per-step pipelining overhead entirely.
        vmem = pl.BlockSpec(memory_space=pltpu.MemorySpace.VMEM)
        return pl.pallas_call(
            critic_kernel,
            out_shape=out_shape,
            in_specs=[vmem, vmem, vmem, vmem, vmem, vmem, vmem, smem_spec],
            out_specs=vmem,
        )(state, action, w1, b1, w2, b2, wq, bq)

    # Batch-tiled path for training-sized batches.
    assert B % batch_block == 0, "batch must be divisible by batch_block"
    resident = lambda shape: pl.BlockSpec(shape, lambda i: (0, 0))
    return pl.pallas_call(
        critic_kernel,
        out_shape=out_shape,
        grid=(B // batch_block,),
        in_specs=[
            pl.BlockSpec((batch_block, S), lambda i: (i, 0)),   # state tile
            pl.BlockSpec((batch_block, A), lambda i: (i, 0)),   # action tile
            resident((S + A, H)),                               # w1
            resident((1, H)),                                   # b1
            resident((H, H)),                                   # w2
            resident((1, H)),                                   # b2
            resident((1, H)),                                   # wq (row vector)
            smem_spec,                                          # bq scalar
        ],
        out_specs=pl.BlockSpec((batch_block, 1), lambda i: (i, 0)),
        compiler_params=pltpu.CompilerParams(
            dimension_semantics=("parallel",)),
    )(state, action, w1, b1, w2, b2, wq, bq)


def init_critic_params(key, state_dim, action_dim, hidden=32):
    """Deterministic init mirroring nn.Linear default (U[-1/sqrt(fan_in), 1/sqrt(fan_in)])."""
    def uniform(key, shape, fan_in):
        bound = 1.0 / (fan_in ** 0.5)
        return jax.random.uniform(key, shape, jnp.float32, -bound, bound)

    k1, k2, k3, k4, k5, k6 = jax.random.split(key, 6)
    d_in = state_dim + action_dim
    w1 = uniform(k1, (d_in, hidden), d_in)          # (in, out)
    b1 = uniform(k2, (1, hidden), d_in)
    w2 = uniform(k3, (hidden, hidden), hidden)
    b2 = uniform(k4, (1, hidden), hidden)
    wq = uniform(k5, (1, hidden), hidden)           # PyTorch layout (out=1, in=H)
    bq = uniform(k6, (1,), hidden)                  # true scalar -> SMEM
    return (w1, b1, w2, b2, wq, bq)


def _reference(state, action, params):
    # Pure-JAX reference of the same math (for correctness checks only).
    w1, b1, w2, b2, wq, bq = params
    x = jnp.concatenate([state, action], axis=1).astype(jnp.float32)
    h1 = jnp.maximum(x @ w1 + b1, 0.0)
    h2 = jnp.maximum(h1 @ w2 + b2, 0.0)
    return h2 @ wq.T + bq


if __name__ == "__main__":
    key = jax.random.PRNGKey(0)
    k_state, k_action, k_params, k_big = jax.random.split(key, 4)

    batch, state_dim, action_dim, hidden = 2, 8, 4, 32
    state = jax.random.normal(k_state, (batch, state_dim), jnp.float32)
    action = jax.random.normal(k_action, (batch, action_dim), jnp.float32)
    params = init_critic_params(k_params, state_dim, action_dim, hidden)

    # Small-batch (inference-style) path: single fused kernel, no grid.
    q = jax.block_until_ready(critic_forward(state, action, params))
    q_ref = _reference(state, action, params)
    assert q.shape == (batch, 1)
    assert jnp.allclose(q, q_ref, atol=1e-5), (q, q_ref)

    # Training-sized batch: exercise the batch-tiled "parallel" grid path
    # (uses both TensorCores on v7x; weights stay VMEM-resident).
    kb1, kb2 = jax.random.split(k_big)
    big_b = 256
    big_state = jax.random.normal(kb1, (big_b, state_dim), jnp.float32)
    big_action = jax.random.normal(kb2, (big_b, action_dim), jnp.float32)
    q_big = jax.block_until_ready(
        critic_forward(big_state, big_action, params, batch_block=128))
    q_big_ref = _reference(big_state, big_action, params)
    assert q_big.shape == (big_b, 1)
    assert jnp.allclose(q_big, q_big_ref, atol=1e-4), (q_big, q_big_ref)

    # NOTE: a single SAC critic at (B=2, hidden=32) occupies ~1.5% of each
    # vreg; fusing twin critics (stacking Q1/Q2 weights along the lane axis)
    # would double useful work per cycle, but the spec is a single Critic so
    # semantics are kept 1:1 here.
    print("KERNEL_OK")
</pallas_src>

<mosaic_0001>
module attributes {stable_mosaic.version = 11 : i64} {
  func.func @critic_kernel(%arg0: memref<2x8xf32, #tpu.memory_space<vmem>>, %arg1: memref<2x4xf32, #tpu.memory_space<vmem>>, %arg2: memref<12x32xf32, #tpu.memory_space<vmem>>, %arg3: memref<1x32xf32, #tpu.memory_space<vmem>>, %arg4: memref<32x32xf32, #tpu.memory_space<vmem>>, %arg5: memref<1x32xf32, #tpu.memory_space<vmem>>, %arg6: memref<1x32xf32, #tpu.memory_space<vmem>>, %arg7: memref<1xf32, #tpu.memory_space<smem>>, %arg8: memref<2x1xf32, #tpu.memory_space<vmem>>) attributes {dimension_semantics = [], scalar_prefetch = 0 : i64, scratch_operands = 0 : i64, tpu.core_type = #tpu.core_type<tc>} {
    %c0 = arith.constant 0 : index
    %c0_0 = arith.constant 0 : index
    %0 = vector.load %arg0[%c0, %c0_0] : memref<2x8xf32, #tpu.memory_space<vmem>>, vector<2x8xf32>
    %c0_1 = arith.constant 0 : index
    %c0_2 = arith.constant 0 : index
    %1 = vector.load %arg1[%c0_1, %c0_2] : memref<2x4xf32, #tpu.memory_space<vmem>>, vector<2x4xf32>
    %c0_3 = arith.constant 0 : index
    %c0_4 = arith.constant 0 : index
    %2 = vector.load %arg2[%c0_3, %c0_4] : memref<12x32xf32, #tpu.memory_space<vmem>>, vector<8x32xf32>
    %cst = arith.constant dense<0.000000e+00> : vector<2x32xf32>
    %3 = tpu.matmul %0, %2, %cst {dimension_numbers = #tpu.dot_dimension_numbers<[1], [0], [0], [1], [0, 0, 1, 1], [], []>} : vector<2x8xf32>, vector<8x32xf32>, vector<2x32xf32> -> vector<2x32xf32>
    %c8 = arith.constant 8 : index
    %c0_5 = arith.constant 0 : index
    %4 = vector.load %arg2[%c8, %c0_5] : memref<12x32xf32, #tpu.memory_space<vmem>>, vector<4x32xf32>
    %cst_6 = arith.constant dense<0.000000e+00> : vector<2x32xf32>
    %5 = tpu.matmul %1, %4, %cst_6 {dimension_numbers = #tpu.dot_dimension_numbers<[1], [0], [0], [1], [0, 0, 1, 1], [], []>} : vector<2x4xf32>, vector<4x32xf32>, vector<2x32xf32> -> vector<2x32xf32>
    %6 = arith.addf %3, %5 : vector<2x32xf32>
    %c0_7 = arith.constant 0 : index
    %c0_8 = arith.constant 0 : index
    %7 = vector.load %arg3[%c0_7, %c0_8] : memref<1x32xf32, #tpu.memory_space<vmem>>, vector<1x32xf32>
    %8 = vector.broadcast %7 : vector<1x32xf32> to vector<2x32xf32>
    %9 = arith.addf %6, %8 : vector<2x32xf32>
    %cst_9 = arith.constant 0.000000e+00 : f32
    %10 = vector.broadcast %cst_9 : f32 to vector<2x32xf32>
    %11 = arith.maximumf %9, %10 : vector<2x32xf32>
    %c0_10 = arith.constant 0 : index
    %c0_11 = arith.constant 0 : index
    %12 = vector.load %arg4[%c0_10, %c0_11] : memref<32x32xf32, #tpu.memory_space<vmem>>, vector<32x32xf32>
    %cst_12 = arith.constant dense<0.000000e+00> : vector<2x32xf32>
    %13 = tpu.matmul %11, %12, %cst_12 {dimension_numbers = #tpu.dot_dimension_numbers<[1], [0], [0], [1], [0, 0, 1, 1], [], []>} : vector<2x32xf32>, vector<32x32xf32>, vector<2x32xf32> -> vector<2x32xf32>
    %c0_13 = arith.constant 0 : index
    %c0_14 = arith.constant 0 : index
    %14 = vector.load %arg5[%c0_13, %c0_14] : memref<1x32xf32, #tpu.memory_space<vmem>>, vector<1x32xf32>
    %15 = vector.broadcast %14 : vector<1x32xf32> to vector<2x32xf32>
    %16 = arith.addf %13, %15 : vector<2x32xf32>
    %cst_15 = arith.constant 0.000000e+00 : f32
    %17 = vector.broadcast %cst_15 : f32 to vector<2x32xf32>
    %18 = arith.maximumf %16, %17 : vector<2x32xf32>
    %c0_16 = arith.constant 0 : index
    %c0_17 = arith.constant 0 : index
    %19 = vector.load %arg6[%c0_16, %c0_17] : memref<1x32xf32, #tpu.memory_space<vmem>>, vector<1x32xf32>
    %20 = vector.broadcast %19 : vector<1x32xf32> to vector<2x32xf32>
    %21 = arith.mulf %18, %20 : vector<2x32xf32>
    %cst_18 = arith.constant dense<0.000000e+00> : vector<2xf32>
    %22 = vector.multi_reduction <add>, %21, %cst_18 [1] : vector<2x32xf32> to vector<2xf32>
    %23 = vector.shape_cast %22 : vector<2xf32> to vector<2x1xf32>
    %c0_19 = arith.constant 0 : index
    %24 = memref.load %arg7[%c0_19] : memref<1xf32, #tpu.memory_space<smem>>
    %25 = vector.broadcast %24 : f32 to vector<2x1xf32>
    %26 = arith.addf %23, %25 : vector<2x1xf32>
    %c0_20 = arith.constant 0 : index
    %c0_21 = arith.constant 0 : index
    %27 = vector.load %arg8[%c0_20, %c0_21] : memref<2x1xf32, #tpu.memory_space<vmem>>, vector<2x1xf32>
    tpu.vector_store %arg8[%c0_20, %c0_21], %26 {strides = array<i32>} : memref<2x1xf32, #tpu.memory_space<vmem>>, vector<2x1xf32>,
    return
  }
}

</mosaic_0001>

<bundles_post_ra>
// kernel: tpu_custom_call.1
= control target key start
LH: loop header
LB: loop body
LE: loop exit
PB: predicated region body
PF: predicated region fallthrough
CT: control target
= control target key end

     0   :  { %14 = vsyncpa [#allocation4], 0  ;;  %s355_s0 = inlined_call_operand.vmem [shape: f32[2,8], index: 0, kind: input, shape index: {}]   ;;  %s356_s1 = inlined_call_operand.hbm [shape: f32[2,4], index: 1, kind: input, shape index: {}]   ;;  %s357_s2 = inlined_call_operand.hbm [shape: f32[12,32], index: 2, kind: input, shape index: {}]   ;;  %s358_s3 = inlined_call_operand.vmem [shape: f32[1,32], index: 3, kind: input, shape index: {}]   ;;  %s359_s4 = inlined_call_operand.hbm [shape: f32[32,32], index: 4, kind: input, shape index: {}]   ;;  %s360_s5 = inlined_call_operand.vmem [shape: f32[1,32], index: 5, kind: input, shape index: {}]   ;;  %s361_s6 = inlined_call_operand.vmem [shape: f32[1,32], index: 6, kind: input, shape index: {}]   ;;  %s362_s7 = inlined_call_operand.<no memory space> [shape: f32[1], index: 7, kind: input, shape index: {}]   ;;  %s363_s8 = inlined_call_operand.vmem [shape: f32[2,1], index: 8, kind: output, shape index: {}]  }
   0x1   :  { %15 = vsyncpa [#allocation6], 0  ;;  %s33_s29 = sshll.u32 %s357_s2, 4  ;;  %s278_s30 = smov [#allocation5]   ;;  %s34_s29 = int_to_ptr.hbm [resolvable:$true] %s33_s29 }
   0x2   :  { %s35_s9 = sshll.u32 %s278_s30, 4  ;;  %s23_s12 = sshll.u32 %s356_s1, 4  ;;  %s36_s9 = int_to_ptr.vmem [resolvable:$true] %s35_s9  ;;  %s24_s12 = int_to_ptr.hbm [resolvable:$true] %s23_s12 }
   0x3   :  { %s279_s13 = smov 128   ;;  %s280_s14 = smov 8  }
   0x4   :  { %41 = dma.hbm_to_vmem [thread:$0]  %s34_s29, 256, %s36_s9, [#allocation6], %s279_s13, %s279_s13, %s280_s14  }
   0x5   :  { %s281_s15 = smov [#allocation3]   ;;  %s48_s19 = sshll.u32 %s359_s4, 4  ;;  %s49_s19 = int_to_ptr.hbm [resolvable:$true] %s48_s19 }
   0x6   :  { %s25_s16 = sshll.u32 %s281_s15, 4  ;;  %s282_s2 = smov [#allocation7]   ;;  %s26_s16 = int_to_ptr.vmem [resolvable:$true] %s25_s16 }
   0x7   :  { %28 = dma.hbm_to_vmem [thread:$0]  %s24_s12, 32, %s26_s16, [#allocation4]  }
   0x8   :  { %s50_s20 = sshll.u32 %s282_s2, 4  ;;  %s51_s20 = int_to_ptr.vmem [resolvable:$true] %s50_s20 }
   0x9   :  { %56 = dma.hbm_to_vmem [thread:$0]  %s49_s19, 512, %s51_s20, [#allocation6], %s279_s13, %s279_s13, %s280_s14  }
   0xa   :  { %274 = dma.done.wait [#allocation4], 32  }
   0xb   :  { %275 = vsyncadd [#allocation4], 4294967264 }
   0xc   :  { %276 = dma.done.wait [#allocation6], 768  }
   0xd   :  { %277 = vsyncadd [#allocation6], 4294966528  ;;  %vm83_vm0 = vcmask 1043456   ;;  %vm79_vm1 = vcmask 31744   ;;  %vm107_vm2 = vcmask 64512   ;;  %v77_v1 = vld [vmem:[#allocation5] sm:$0xff]  ;;  %v180_v21 = vstv %s362_s7 }
   0xe   :  { %v78_v0 = vld [vmem:[#allocation5 + $0x8] sm:$0xf]  ;;  %v76_v2 = vld [vmem:[#allocation3] sm:$0x3]  ;;  %126 = vmatpush.msra.mxu1 %v77_v1  ;;  %v139_v5 = vld [vmem:[#allocation7 + $0x10] sm:$0xff]  ;;  %vm145_vm3 = vcmask 261120  }
   0xf   :  { %190 = vmatpush.msk.msra.mxu0 %vm83_vm0, %v78_v0  ;;  %v75_v3 = vld [vmem:[%s355_s0] sm:$0x3]  ;;  %v140_v4 = vld [vmem:[#allocation7 + $0x18] sm:$0xff]  ;;  %v137_v7 = vld [vmem:[#allocation7] sm:$0xff]  ;;  %vm175_vm4 = vcmask 254976   ;;  %vm182_vm5 = vcmask 1024  }
  0x10   :  { %191 = vmatmul.msk.f32.vlgmr.msra.gmra.mxu0 %vm79_vm1, %v76_v2  ;;  %192 = vmatmul.msk.f32.vlgmr.msra.gmra.mxu1 %vm107_vm2, %v75_v3  ;;  %v138_v6 = vld [vmem:[#allocation7 + $0x8] sm:$0xff] }
  0x11   :  { %161 = vmatpush.msra.mxu2 %v140_v4  ;;  %v199_v8 = vld [vmem:[%s358_s3] ss:$0 sm:$0xff] }
  0x12   :  { %v200_v14 = vld [vmem:[%s360_s5] ss:$0 sm:$0xff] }
  0x13   :  { %162 = vmatpush.msra.mxu2 %v139_v5  ;;  %v201_v17 = vld [vmem:[%s361_s6] ss:$0 sm:$0xff] }
  0x15   :  { %163 = vmatpush.msra.mxu2 %v138_v6 }
  0x17   :  { %164 = vmatpush.msra.mxu2 %v137_v7 }
  0x8d   :  { %v104_v9 = vpop.f32.mrf.mxu0  ;;  %v128_v10 = vpop.f32.mrf.mxu1 }
  0x8e   :  { %v129_v11 = vadd.f32 %v128_v10, %v104_v9 }
  0x90   :  { %v135_v12 = vadd.f32 %v199_v8, %v129_v11 }
  0x92   :  { %v136_v13 = vmax.f32 %v135_v12, 0.0 }
  0x94   :  { %193 = vmatmul.msk.f32.vlgmr.msra.gmra.mxu2 %vm145_vm3, %v136_v13 }
 0x117   :  { %v166_v15 = vpop.f32.mrf.mxu2 }
 0x118   :  { %v167_v16 = vadd.f32 %v200_v14, %v166_v15 }
 0x11a   :  { %v169_v18 = vmax.f32 %v167_v16, 0.0 }
 0x11c   :  { %v174_v19 = vmul.f32 %v201_v17, %v169_v18 }
 0x11e   :  { %v176_v20 = vsel %vm175_vm4, %v174_v19, 0.0 }
 0x11f   :  { %177 = vadd.xlane.f32.xlu0 %v176_v20 }
 0x192   :  { %v178_v22 = vpop.xlane.xlu0 %177 }
 0x193   :  { %v181_v23 = vadd.f32 %v180_v21, %v178_v22 }
 0x195   :  { %183 = vst.msk [vmem:[%s363_s8] sm:$0x3] %vm182_vm5, %v181_v23 }
 0x196   :  { %188 = vsyncpa [#allocation4], 1 }
 0x197   :  { %189 = vsyncpa [#allocation6], 1 }

</bundles_post_ra>
